<compile_context>
chip_gen: v7x
topology: tpu7x:2x2x1
jax: 0.10.0
libtpu: 0.0.40
codegen_flags: <defaults>
</compile_context>

<pallas_src>
import functools

import jax
import jax.numpy as jnp
from jax.experimental import pallas as pl
from jax.experimental.pallas import tpu as pltpu

EPS = 1e-5
# Leave headroom below v7x's 64 MiB physical VMEM (also < v5e/v6e 128 MiB).
VMEM_LIMIT = 48 * 1024 * 1024


def _layernorm(t, g, b):
    m = jnp.mean(t, axis=-1, keepdims=True)
    v = jnp.mean((t - m) ** 2, axis=-1, keepdims=True)
    return (t - m) * jax.lax.rsqrt(v + EPS) * g + b


# -----------------------------------------------------------------------------
# Kernel A: LayerNorm(x) + fused QKV projection (single MXU pass, 3x-wide N).
# -----------------------------------------------------------------------------
def _ln_qkv_kernel(x_ref, g_ref, b_ref, w_ref, bias_ref, q_ref, k_ref, v_ref,
                   *, dim):
    xn = _layernorm(x_ref[0], g_ref[0], b_ref[0])                    # (tn, dim)
    # Plain (M,K)x(K,N): weight is pre-transposed/stacked to (dim, 3*dim).
    y = jnp.dot(xn.astype(w_ref.dtype), w_ref[...],
                preferred_element_type=jnp.float32) + bias_ref[0]    # (tn, 3dim)
    q_ref[0] = y[:, :dim].astype(q_ref.dtype)
    k_ref[0] = y[:, dim:2 * dim].astype(k_ref.dtype)
    v_ref[0] = y[:, 2 * dim:].astype(v_ref.dtype)


# -----------------------------------------------------------------------------
# Kernel B: flash attention over one head-group tile + fused output projection.
# -----------------------------------------------------------------------------
def _flash_attn_kernel(q_ref, k_ref, v_ref, gq_ref, bq_ref, gk_ref, bk_ref,
                       wo_ref, o_ref, m_ref, l_ref, acc_ref, oacc_ref,
                       *, d, group):
    gi = pl.program_id(2)                      # head-group index   (arbitrary)
    ki = pl.program_id(3)                      # kv-tile index      (arbitrary)
    last_g = pl.num_programs(2) - 1
    last_k = pl.num_programs(3) - 1

    @pl.when(jnp.logical_and(gi == 0, ki == 0))
    def _init_out():
        oacc_ref[...] = jnp.zeros(oacc_ref.shape, oacc_ref.dtype)

    @pl.when(ki == 0)
    def _init_flash():
        m_ref[...] = jnp.full(m_ref.shape, -jnp.inf, m_ref.dtype)
        l_ref[...] = jnp.zeros(l_ref.shape, l_ref.dtype)
        acc_ref[...] = jnp.zeros(acc_ref.shape, acc_ref.dtype)

    q_all = q_ref[0]                                   # (tq, gd)
    k_all = k_ref[0]                                   # (tk, gd)
    v_all = v_ref[0]                                   # (tk, gd)
    gq, bq = gq_ref[0], bq_ref[0]       # 1/sqrt(d) scale already folded in
    gk, bk = gk_ref[0], bk_ref[0]

    # Static per-head loop inside the group; all per-head state goes straight
    # into scratch refs (bounded live ranges, no concat).  group == 1 whenever
    # d is already a multiple of 128, in which case the slices are no-ops.
    for h in range(group):
        lo, hi = h * d, (h + 1) * d
        qh = _layernorm(q_all[:, lo:hi].astype(jnp.float32), gq, bq)   # (tq, d)
        kh = _layernorm(k_all[:, lo:hi].astype(jnp.float32), gk, bk)   # (tk, d)
        s = jax.lax.dot_general(qh.astype(q_all.dtype), kh.astype(k_all.dtype),
                                (((1,), (1,)), ((), ())),
                                preferred_element_type=jnp.float32)    # (tq, tk)
        m_prev = m_ref[h]                                              # (tq, 1)
        m_new = jnp.maximum(m_prev, jnp.max(s, axis=-1, keepdims=True))
        alpha = jnp.exp(m_prev - m_new)
        p = jnp.exp(s - m_new)
        l_ref[h] = alpha * l_ref[h] + jnp.sum(p, axis=-1, keepdims=True)
        acc_ref[h] = alpha * acc_ref[h] + jnp.dot(
            p.astype(v_all.dtype), v_all[:, lo:hi],
            preferred_element_type=jnp.float32)
        m_ref[h] = m_new

    @pl.when(ki == last_k)
    def _project():
        # Fused to_out: accumulate this head-group's partial projection.
        # Exact division (no approx reciprocal) for the softmax normalisation.
        for h in range(group):
            o_h = acc_ref[h] / l_ref[h]                                # (tq, d)
            oacc_ref[...] += jnp.dot(o_h.astype(wo_ref.dtype),
                                     wo_ref[h * d:(h + 1) * d, :],
                                     preferred_element_type=jnp.float32)

    @pl.when(jnp.logical_and(gi == last_g, ki == last_k))
    def _write():
        o_ref[0] = oacc_ref[...].astype(o_ref.dtype)


# -----------------------------------------------------------------------------
# Wrapper
# -----------------------------------------------------------------------------
def _pick_seq_tile(n):
    for cand in (512, 256, 128):
        if n > cand and n % cand == 0:
            return cand
    return n


def attention_forward(x, params, heads, *, mxu_dtype=jnp.float32):
    b, n, dim = x.shape
    assert dim % heads == 0
    d = dim // heads
    scale = d ** (-0.5)

    tn = _pick_seq_tile(n)           # Kernel A sequence tile
    tq = _pick_seq_tile(n)           # Kernel B q tile
    tk = _pick_seq_tile(n)           # Kernel B kv tile
    n_seq, n_q, n_kv = n // tn, n // tq, n // tk

    # Head-group width: smallest divisor of `heads` whose lane width (g*d) is a
    # multiple of 128; otherwise all heads in one group (block == full dim).
    group = heads
    for g in range(1, heads + 1):
        if heads % g == 0 and (g * d) % 128 == 0:
            group = g
            break
    n_grp = heads // group
    gd = group * d

    row = lambda a: a.reshape(1, -1)

    # Pre-transposed, stacked weights (K-major) built once in the wrapper.
    w_qkv_t = jnp.concatenate(
        [params["wq"].T, params["wk"].T, params["wv"].T], axis=1).astype(mxu_dtype)
    b_qkv = row(jnp.concatenate([params["bq"], params["bk"], params["bv"]]))
    wo_t = params["wo"].T.astype(mxu_dtype)                      # (dim, dim)

    # Fold the 1/sqrt(d) scale into the q-LayerNorm affine params.
    gq = row(params["qn_g"] * scale)
    bq = row(params["qn_b"] * scale)
    gk = row(params["kn_g"])
    bk = row(params["kn_b"])

    # Constant-index-map blocks (weights / LN params): single-buffered.
    def const(shape):
        return pl.BlockSpec(shape, lambda *_: (0,) * len(shape),
                            pipeline_mode=pl.Buffered(1))

    qkv_dtype = mxu_dtype      # bf16 storage halves the q/k/v HBM round trip

    # ---- Kernel A: LN + fused QKV projection --------------------------------
    seq_spec = pl.BlockSpec((1, tn, dim), lambda bi, ti: (bi, ti, 0))
    q, k, v = pl.pallas_call(
        functools.partial(_ln_qkv_kernel, dim=dim),
        out_shape=(jax.ShapeDtypeStruct((b, n, dim), qkv_dtype),) * 3,
        grid_spec=pltpu.PrefetchScalarGridSpec(
            num_scalar_prefetch=0,
            grid=(b, n_seq),
            in_specs=[seq_spec,
                      const((1, dim)), const((1, dim)),
                      const((dim, 3 * dim)), const((1, 3 * dim))],
            out_specs=[seq_spec, seq_spec, seq_spec],
        ),
        compiler_params=pltpu.CompilerParams(
            dimension_semantics=("parallel", "parallel"),
            vmem_limit_bytes=VMEM_LIMIT),
    )(x, row(params["norm_g"]), row(params["norm_b"]), w_qkv_t, b_qkv)

    # ---- Kernel B: flash attention + fused output projection ----------------
    q_spec = pl.BlockSpec((1, tq, gd), lambda bi, qi, gi, ki: (bi, qi, gi))
    kv_spec = pl.BlockSpec((1, tk, gd), lambda bi, qi, gi, ki: (bi, ki, gi))
    wo_spec = pl.BlockSpec((gd, dim), lambda bi, qi, gi, ki: (gi, 0))
    out_spec = pl.BlockSpec((1, tq, dim), lambda bi, qi, gi, ki: (bi, qi, 0))

    return pl.pallas_call(
        functools.partial(_flash_attn_kernel, d=d, group=group),
        out_shape=jax.ShapeDtypeStruct((b, n, dim), jnp.float32),
        grid_spec=pltpu.PrefetchScalarGridSpec(
            num_scalar_prefetch=0,
            grid=(b, n_q, n_grp, n_kv),
            in_specs=[q_spec, kv_spec, kv_spec,
                      const((1, d)), const((1, d)),
                      const((1, d)), const((1, d)),
                      wo_spec],
            out_specs=out_spec,
            scratch_shapes=[
                pltpu.VMEM((group, tq, 1), jnp.float32),    # m (running max)
                pltpu.VMEM((group, tq, 1), jnp.float32),    # l (running denom)
                pltpu.VMEM((group, tq, d), jnp.float32),    # per-head acc
                pltpu.VMEM((tq, dim), jnp.float32),         # fused to_out acc
            ],
        ),
        compiler_params=pltpu.CompilerParams(
            dimension_semantics=("parallel", "parallel", "arbitrary", "arbitrary"),
            vmem_limit_bytes=VMEM_LIMIT),
    )(q, k, v, gq, bq, gk, bk, wo_t)


# -----------------------------------------------------------------------------
# Pure-JAX reference (mirrors the PyTorch forward) for correctness checks.
# -----------------------------------------------------------------------------
def attention_reference(x, params, heads):
    b, n, dim = x.shape
    d = dim // heads
    scale = d ** (-0.5)

    def ln(t, g, bta):
        m = jnp.mean(t, axis=-1, keepdims=True)
        v_ = jnp.mean((t - m) ** 2, axis=-1, keepdims=True)
        return (t - m) / jnp.sqrt(v_ + EPS) * g + bta

    xn = ln(x, params["norm_g"], params["norm_b"])
    q = xn @ params["wq"].T + params["bq"]
    k = xn @ params["wk"].T + params["bk"]
    v = xn @ params["wv"].T + params["bv"]
    rearr = lambda t: t.reshape(b, n, heads, d).transpose(0, 2, 1, 3)
    q, k, v = rearr(q), rearr(k), rearr(v)
    q = ln(q, params["qn_g"], params["qn_b"]) * scale
    k = ln(k, params["kn_g"], params["kn_b"])
    sim = jnp.einsum("bhid,bhjd->bhij", q, k)
    attn = jax.nn.softmax(sim, axis=-1)
    o = jnp.einsum("bhij,bhjd->bhid", attn, v)
    o = o.transpose(0, 2, 1, 3).reshape(b, n, dim)
    return o @ params["wo"].T


def _make_params(key, dim, heads):
    d = dim // heads
    ks = jax.random.split(key, 8)
    return {
        "norm_g": jnp.ones((dim,), jnp.float32),
        "norm_b": jnp.zeros((dim,), jnp.float32) + 0.01,
        "qn_g": jnp.ones((d,), jnp.float32) * 1.1,
        "qn_b": jnp.zeros((d,), jnp.float32) + 0.02,
        "kn_g": jnp.ones((d,), jnp.float32) * 0.9,
        "kn_b": jnp.zeros((d,), jnp.float32) - 0.02,
        "wq": jax.random.normal(ks[0], (dim, dim), jnp.float32) * 0.1,
        "bq": jax.random.normal(ks[1], (dim,), jnp.float32) * 0.05,
        "wk": jax.random.normal(ks[2], (dim, dim), jnp.float32) * 0.1,
        "bk": jax.random.normal(ks[3], (dim,), jnp.float32) * 0.05,
        "wv": jax.random.normal(ks[4], (dim, dim), jnp.float32) * 0.1,
        "bv": jax.random.normal(ks[5], (dim,), jnp.float32) * 0.05,
        "wo": jax.random.normal(ks[6], (dim, dim), jnp.float32) * 0.1,
    }


if __name__ == "__main__":
    key = jax.random.PRNGKey(0)
    k1, k2, kx1, kx2 = jax.random.split(key, 4)

    # Case 1: module-default heads=16 at a tiny shape (single tile everywhere).
    B, N, DIM, HEADS = 2, 8, 64, 16
    params = _make_params(k1, DIM, HEADS)
    x = jax.random.normal(kx1, (B, N, DIM), jnp.float32)

    out = jax.block_until_ready(attention_forward(x, params, HEADS))
    ref = attention_reference(x, params, HEADS)
    assert out.shape == (B, N, DIM)
    err = jnp.max(jnp.abs(out - ref))
    assert jnp.allclose(out, ref, atol=1e-4, rtol=1e-4), \
        f"f32 max abs diff = {err}"

    # Optional bf16 MXU-operand / bf16 q,k,v-storage path (v5e/v6e/v7x perf
    # option); f32 accumulation and f32 elementwise math.  Loose sanity check
    # against the f32 reference (bf16 operand rounding only).
    out_bf16 = jax.block_until_ready(
        attention_forward(x, params, HEADS, mxu_dtype=jnp.bfloat16))
    assert bool(jnp.all(jnp.isfinite(out_bf16)))
    errb = jnp.max(jnp.abs(out_bf16 - ref))
    assert jnp.allclose(out_bf16, ref, atol=2e-1, rtol=2e-1), \
        f"bf16 max abs diff = {errb}"

    # Case 2: exercises the multi-tile flash accumulation (n_q = n_kv = 2),
    # two head-groups (n_grp = 2) and the fused output-projection accumulation.
    B2, N2, DIM2, HEADS2 = 1, 256, 256, 2
    params2 = _make_params(k2, DIM2, HEADS2)
    x2 = jax.random.normal(kx2, (B2, N2, DIM2), jnp.float32)
    out2 = jax.block_until_ready(attention_forward(x2, params2, HEADS2))
    ref2 = attention_reference(x2, params2, HEADS2)
    err2 = jnp.max(jnp.abs(out2 - ref2))
    assert jnp.allclose(out2, ref2, atol=1e-3, rtol=1e-3), \
        f"case-2 max abs diff = {err2}"

    print("KERNEL_OK")
</pallas_src>

<mosaic_0001>
module attributes {stable_mosaic.version = 11 : i64} {
  func.func @_ln_qkv_kernel(%arg0: i32, %arg1: i32, %arg2: memref<1x8x64xf32, #tpu.memory_space<vmem>>, %arg3: memref<1x64xf32, #tpu.memory_space<vmem>>, %arg4: memref<1x64xf32, #tpu.memory_space<vmem>>, %arg5: memref<64x192xf32, #tpu.memory_space<vmem>>, %arg6: memref<1x192xf32, #tpu.memory_space<vmem>>, %arg7: memref<1x8x64xf32, #tpu.memory_space<vmem>>, %arg8: memref<1x8x64xf32, #tpu.memory_space<vmem>>, %arg9: memref<1x8x64xf32, #tpu.memory_space<vmem>>) attributes {dimension_semantics = [#tpu.dimension_semantics<parallel>, #tpu.dimension_semantics<parallel>], iteration_bounds = array<i64: 2, 1>, scalar_prefetch = 0 : i64, scratch_operands = 0 : i64, tpu.core_type = #tpu.core_type<tc>, window_params = [{transform_indices = @transform_0, window_bounds = array<i64: 1, 8, 64>}, {pipeline_mode = #tpu.pipeline_mode<synchronous>, transform_indices = @transform_1, window_bounds = array<i64: 1, 64>}, {pipeline_mode = #tpu.pipeline_mode<synchronous>, transform_indices = @transform_2, window_bounds = array<i64: 1, 64>}, {pipeline_mode = #tpu.pipeline_mode<synchronous>, transform_indices = @transform_3, window_bounds = array<i64: 64, 192>}, {pipeline_mode = #tpu.pipeline_mode<synchronous>, transform_indices = @transform_4, window_bounds = array<i64: 1, 192>}, {transform_indices = @transform_5, window_bounds = array<i64: 1, 8, 64>}, {transform_indices = @transform_6, window_bounds = array<i64: 1, 8, 64>}, {transform_indices = @transform_7, window_bounds = array<i64: 1, 8, 64>}]} {
    %c0 = arith.constant 0 : index
    %c0_0 = arith.constant 0 : index
    %c0_1 = arith.constant 0 : index
    %0 = vector.load %arg2[%c0, %c0_0, %c0_1] : memref<1x8x64xf32, #tpu.memory_space<vmem>>, vector<1x8x64xf32>
    %1 = vector.shape_cast %0 : vector<1x8x64xf32> to vector<8x64xf32>
    %c0_2 = arith.constant 0 : index
    %c0_3 = arith.constant 0 : index
    %2 = vector.load %arg3[%c0_2, %c0_3] : memref<1x64xf32, #tpu.memory_space<vmem>>, vector<1x64xf32>
    %3 = vector.shape_cast %2 : vector<1x64xf32> to vector<64xf32>
    %c0_4 = arith.constant 0 : index
    %c0_5 = arith.constant 0 : index
    %4 = vector.load %arg4[%c0_4, %c0_5] : memref<1x64xf32, #tpu.memory_space<vmem>>, vector<1x64xf32>
    %5 = vector.shape_cast %4 : vector<1x64xf32> to vector<64xf32>
    %cst = arith.constant dense<0.000000e+00> : vector<8xf32>
    %6 = vector.multi_reduction <add>, %1, %cst [1] : vector<8x64xf32> to vector<8xf32>
    %7 = vector.shape_cast %6 : vector<8xf32> to vector<8x1xf32>
    %cst_6 = arith.constant 6.400000e+01 : f32
    %8 = vector.broadcast %cst_6 : f32 to vector<8x1xf32>
    %9 = arith.divf %7, %8 : vector<8x1xf32>
    %10 = vector.broadcast %9 : vector<8x1xf32> to vector<8x64xf32>
    %11 = arith.subf %1, %10 : vector<8x64xf32>
    %12 = arith.mulf %11, %11 : vector<8x64xf32>
    %cst_7 = arith.constant dense<0.000000e+00> : vector<8xf32>
    %13 = vector.multi_reduction <add>, %12, %cst_7 [1] : vector<8x64xf32> to vector<8xf32>
    %14 = vector.shape_cast %13 : vector<8xf32> to vector<8x1xf32>
    %cst_8 = arith.constant 6.400000e+01 : f32
    %15 = vector.broadcast %cst_8 : f32 to vector<8x1xf32>
    %16 = arith.divf %14, %15 : vector<8x1xf32>
    %17 = vector.broadcast %9 : vector<8x1xf32> to vector<8x64xf32>
    %18 = arith.subf %1, %17 : vector<8x64xf32>
    %cst_9 = arith.constant 9.99999974E-6 : f32
    %19 = vector.broadcast %cst_9 : f32 to vector<8x1xf32>
    %20 = arith.addf %16, %19 : vector<8x1xf32>
    %21 = math.rsqrt %20 : vector<8x1xf32>
    %22 = vector.broadcast %21 : vector<8x1xf32> to vector<8x64xf32>
    %23 = arith.mulf %18, %22 : vector<8x64xf32>
    %24 = vector.shape_cast %3 : vector<64xf32> to vector<1x64xf32>
    %25 = vector.broadcast %24 : vector<1x64xf32> to vector<8x64xf32>
    %26 = arith.mulf %23, %25 : vector<8x64xf32>
    %27 = vector.shape_cast %5 : vector<64xf32> to vector<1x64xf32>
    %28 = vector.broadcast %27 : vector<1x64xf32> to vector<8x64xf32>
    %29 = arith.addf %26, %28 : vector<8x64xf32>
    %c0_10 = arith.constant 0 : index
    %c0_11 = arith.constant 0 : index
    %30 = vector.load %arg5[%c0_10, %c0_11] : memref<64x192xf32, #tpu.memory_space<vmem>>, vector<64x192xf32>
    %cst_12 = arith.constant dense<0.000000e+00> : vector<8x192xf32>
    %31 = tpu.matmul %29, %30, %cst_12 {dimension_numbers = #tpu.dot_dimension_numbers<[1], [0], [0], [1], [0, 0, 1, 1], [], []>} : vector<8x64xf32>, vector<64x192xf32>, vector<8x192xf32> -> vector<8x192xf32>
    %c0_13 = arith.constant 0 : index
    %c0_14 = arith.constant 0 : index
    %32 = vector.load %arg6[%c0_13, %c0_14] : memref<1x192xf32, #tpu.memory_space<vmem>>, vector<1x192xf32>
    %33 = vector.shape_cast %32 : vector<1x192xf32> to vector<192xf32>
    %34 = vector.shape_cast %33 : vector<192xf32> to vector<1x192xf32>
    %35 = vector.broadcast %34 : vector<1x192xf32> to vector<8x192xf32>
    %36 = arith.addf %31, %35 : vector<8x192xf32>
    %37 = vector.extract_strided_slice %36 {offsets = [0, 0], sizes = [8, 64], strides = [1, 1]} : vector<8x192xf32> to vector<8x64xf32>
    %c0_15 = arith.constant 0 : index
    %c0_16 = arith.constant 0 : index
    %c0_17 = arith.constant 0 : index
    %38 = vector.load %arg7[%c0_15, %c0_16, %c0_17] : memref<1x8x64xf32, #tpu.memory_space<vmem>>, vector<1x8x64xf32>
    %39 = vector.shape_cast %38 : vector<1x8x64xf32> to vector<8x64xf32>
    %40 = vector.shape_cast %37 : vector<8x64xf32> to vector<1x8x64xf32>
    tpu.vector_store %arg7[%c0_15, %c0_16, %c0_17], %40 {strides = array<i32>} : memref<1x8x64xf32, #tpu.memory_space<vmem>>, vector<1x8x64xf32>,
    %41 = vector.extract_strided_slice %36 {offsets = [0, 64], sizes = [8, 64], strides = [1, 1]} : vector<8x192xf32> to vector<8x64xf32>
    %c0_18 = arith.constant 0 : index
    %c0_19 = arith.constant 0 : index
    %c0_20 = arith.constant 0 : index
    %42 = vector.load %arg8[%c0_18, %c0_19, %c0_20] : memref<1x8x64xf32, #tpu.memory_space<vmem>>, vector<1x8x64xf32>
    %43 = vector.shape_cast %42 : vector<1x8x64xf32> to vector<8x64xf32>
    %44 = vector.shape_cast %41 : vector<8x64xf32> to vector<1x8x64xf32>
    tpu.vector_store %arg8[%c0_18, %c0_19, %c0_20], %44 {strides = array<i32>} : memref<1x8x64xf32, #tpu.memory_space<vmem>>, vector<1x8x64xf32>,
    %45 = vector.extract_strided_slice %36 {offsets = [0, 128], sizes = [8, 64], strides = [1, 1]} : vector<8x192xf32> to vector<8x64xf32>
    %c0_21 = arith.constant 0 : index
    %c0_22 = arith.constant 0 : index
    %c0_23 = arith.constant 0 : index
    %46 = vector.load %arg9[%c0_21, %c0_22, %c0_23] : memref<1x8x64xf32, #tpu.memory_space<vmem>>, vector<1x8x64xf32>
    %47 = vector.shape_cast %46 : vector<1x8x64xf32> to vector<8x64xf32>
    %48 = vector.shape_cast %45 : vector<8x64xf32> to vector<1x8x64xf32>
    tpu.vector_store %arg9[%c0_21, %c0_22, %c0_23], %48 {strides = array<i32>} : memref<1x8x64xf32, #tpu.memory_space<vmem>>, vector<1x8x64xf32>,
    return
  }
  func.func @transform_0(%arg0: i32, %arg1: i32) -> (i32, i32, i32) {
    %c0_i32 = arith.constant 0 : i32
    %c0_i32_0 = arith.constant 0 : i32
    return %arg0, %arg1, %c0_i32 : i32, i32, i32
  }
  func.func @transform_1(%arg0: i32, %arg1: i32) -> (i32, i32) {
    %c0_i32 = arith.constant 0 : i32
    %c0_i32_0 = arith.constant 0 : i32
    %c0_i32_1 = arith.constant 0 : i32
    return %c0_i32, %c0_i32_0 : i32, i32
  }
  func.func @transform_2(%arg0: i32, %arg1: i32) -> (i32, i32) {
    %c0_i32 = arith.constant 0 : i32
    %c0_i32_0 = arith.constant 0 : i32
    %c0_i32_1 = arith.constant 0 : i32
    return %c0_i32, %c0_i32_0 : i32, i32
  }
  func.func @transform_3(%arg0: i32, %arg1: i32) -> (i32, i32) {
    %c0_i32 = arith.constant 0 : i32
    %c0_i32_0 = arith.constant 0 : i32
    %c0_i32_1 = arith.constant 0 : i32
    return %c0_i32, %c0_i32_0 : i32, i32
  }
  func.func @transform_4(%arg0: i32, %arg1: i32) -> (i32, i32) {
    %c0_i32 = arith.constant 0 : i32
    %c0_i32_0 = arith.constant 0 : i32
    %c0_i32_1 = arith.constant 0 : i32
    return %c0_i32, %c0_i32_0 : i32, i32
  }
  func.func @transform_5(%arg0: i32, %arg1: i32) -> (i32, i32, i32) {
    %c0_i32 = arith.constant 0 : i32
    %c0_i32_0 = arith.constant 0 : i32
    return %arg0, %arg1, %c0_i32 : i32, i32, i32
  }
  func.func @transform_6(%arg0: i32, %arg1: i32) -> (i32, i32, i32) {
    %c0_i32 = arith.constant 0 : i32
    %c0_i32_0 = arith.constant 0 : i32
    return %arg0, %arg1, %c0_i32 : i32, i32, i32
  }
  func.func @transform_7(%arg0: i32, %arg1: i32) -> (i32, i32, i32) {
    %c0_i32 = arith.constant 0 : i32
    %c0_i32_0 = arith.constant 0 : i32
    return %arg0, %arg1, %c0_i32 : i32, i32, i32
  }
}

</mosaic_0001>

<bundles_post_ra>
// kernel: tpu_custom_call.1
= control target key start
LH: loop header
LB: loop body
LE: loop exit
PB: predicated region body
PF: predicated region fallthrough
CT: control target
= control target key end

     0   :  { %s1380_s0 = inlined_call_operand.hbm [shape: f32[2,8,64], index: 0, kind: input, shape index: {}]   ;;  %s1381_s1 = inlined_call_operand.vmem [shape: f32[1,64], index: 1, kind: input, shape index: {}]   ;;  %s1382_s2 = inlined_call_operand.vmem [shape: f32[1,64], index: 2, kind: input, shape index: {}]   ;;  %s1383_s3 = inlined_call_operand.hbm [shape: f32[64,192], index: 3, kind: input, shape index: {}]   ;;  %s1384_s4 = inlined_call_operand.vmem [shape: f32[1,192], index: 4, kind: input, shape index: {}]   ;;  %s1385_s5 = inlined_call_operand.hbm [shape: f32[2,8,64], index: 5, kind: output, shape index: {0}]   ;;  %s1386_s6 = inlined_call_operand.hbm [shape: f32[2,8,64], index: 6, kind: output, shape index: {1}]   ;;  %s1387_s7 = inlined_call_operand.hbm [shape: f32[2,8,64], index: 7, kind: output, shape index: {2}]  }
   0x1   :  { %1393 = sst [smem:[#allocation16_spill]] %s1383_s3 }
   0x2   :  { %13 = vsyncpa [#allocation3], 0 }
   0x3   :  { %15 = vsyncpa [#allocation3 + $0x1], 0 }
   0x4   :  { %16 = vsyncpa [#allocation6], 0 }
   0x5   :  { %17 = vsyncpa [#allocation4], 0 }
   0x6   :  { %19 = vsyncpa [#allocation4 + $0x1], 0 }
   0x7   :  { %20 = vsyncpa [#allocation9], 0 }
   0x8   :  { %22 = vsyncpa [#allocation9 + $0x1], 0  ;;  %s1079_s24 = smov 0   ;;  %s1081_s25 = smov 0  }
   0x9   :  { %s1083_s26 = smov 0   ;;  %s1085_s27 = smov 0  }
   0xa   :  { %s1087_s28 = smov 0   ;;  %s1089_s29 = smov 0  }
   0xb LB: > { %s1110_s30 = sadd.s32 4294967295, %s1028_s29   ;;  %s1391_s8 = sadd.s32 4294967294, %s1028_s29   ;;  %s1028_s29 = sphi %s1089_s29, %s28_s29   ;;  %s1024_s28 = sphi %s1087_s28, %s1416_s28   ;;  %s1020_s27 = sphi %s1085_s27, %s1415_s27   ;;  %s1016_s26 = sphi %s1083_s26, %s1414_s26   ;;  %s1012_s25 = sphi %s1081_s25, %s1413_s25   ;;  %s1008_s24 = sphi %s1079_s24, %s1412_s24  }
   0xc   : > { %p62_p0 = scmp.ne.s32.totalorder %s1012_s25, %s1008_s24  ;;  %p1388_p1 = scmp.eq.s32.totalorder %s1110_s30, 0 }
   0xd   : > { %p178_p3 = scmp.eq.s32.totalorder %s1391_s8, 1  ;;  %p697_p5 = scmp.ge.s32.totalorder %s1028_s29, 1 }
   0xe   : > { %p1121_p4 = por %p1388_p1, %p62_p0  ;;  %p241_p7 = scmp.lt.s32.totalorder %s1028_s29, 3 }
   0xf   : > { %p1126_p6 = por %p178_p3, %p62_p0  ;;  %s1030_s12 = smov [#allocation5]  }
  0x10   : > { %s1394_s9 = scalar_select %p1121_p4, 1, 0 }
  0x11   : > { %s1395_s10 = scalar_select %p1126_p6, 1, 0 }
  0x12   : > { %p1131_p8 = pnand %p697_p5, %p241_p7  ;;  %s259_s13 = sshll.u32 %s1030_s12, 4  ;;  %s260_s13 = int_to_ptr.vmem [resolvable:$true] %s259_s13 }
  0x13   : > { %s40_s15 = sadd.s32 1, %s1024_s28  ;;  %s1398_s3 = sld [smem:[#allocation16_spill]] }
  0x14   : > { %s1396_s11 = scalar_select %p1131_p8, 1, 0 }
  0x15   : > { %p747_p9 = pneg %p1131_p8 }
  0x17   : > { %p1140_p11 = pnand %p747_p9, %p1388_p1 }
  0x19   : > { %s824_s18 = scalar_lea.hbm %s1398_s3, 2048  ;;  %p826_p13 = pneg %p1140_p11 }
  0x1a   : > { %p825_p12 = scmp.ne.s32.totalorder %s1398_s3, %s824_s18  ;;  %p831_p5 = scmp.lt.u32.totalorder %s824_s18, %s1398_s3 }
  0x1c   : > { %p827_p0 = pnand %p826_p13, %p825_p12 }
  0x1e   : > { %p828_p3 = pneg %p827_p0 }
  0x20   : > { %p833_p7 = pnand %p831_p5, %p828_p3 }
  0x22   : > { %836 = shalt.err (!%p833_p7)
}
  0x23   : > { %s837_s23 = scalar_lea.vmem %s260_s13, 2048  ;;  %p845_p2 = scmp.lt.s32.totalorder %s260_s13, %s260_s13 }
  0x24   : > { %p838_p9 = scmp.ne.s32.totalorder %s260_s13, %s837_s23  ;;  %p846_p6 = scmp.lt.s32.totalorder %s837_s23, %s837_s23 }
  0x26   : > { %p840_p10 = pnand %p838_p9, %p826_p13  ;;  %p847_p4 = por %p846_p6, %p845_p2 }
  0x28   : > { %p841_p1 = pneg %p840_p10 }
  0x2a   : > { %p848_p8 = pnand %p847_p4, %p841_p1 }
  0x2c   : > { %851 = shalt.err (!%p848_p8)
}
  0x2d   : > { %s1031_s12 = smov 256   ;;  %s1032_s16 = smov 16  }
  0x2e   : > { %750 = dma.hbm_to_vmem [thread:$0]  (!%p1140_p11), %s1398_s3, 2048, %s260_s13, [#allocation6], %s1031_s12, %s1031_s12, %s1032_s16  }
  0x2f   : > { %p42_p1 = scmp.ge.s32.totalorder %s40_s15, 2  ;;  %s49_s19 = sadd.s32 1, %s1016_s26 }
  0x30   : > { %p56_p2 = scmp.ne.s32.totalorder %s1016_s26, %s1012_s25  ;;  %p57_p4 = scmp.eq.s32.totalorder %s1028_s29, 0 }
  0x31   : > { %s1418_s15 = smov (%p42_p1, %s40_s15), 0  ;;  %p1401_p8 = scmp.eq.s32.totalorder %s1110_s30, 1 }
  0x32   : > { %1399 = sst [smem:[#allocation15_spill]] %s1418_s15  ;;  %p1167_p6 = por %p57_p4, %p56_p2 }
  0x33   : > { %p1173_p10 = por %p1401_p8, %p56_p2  ;;  %s44_s14 = ssub.s32 %s1024_s28, %s1418_s15 }
  0x34   : > { %p766_p12 = scmp.lt.s32.totalorder %s1028_s29, 2  ;;  %p47_p11 = scmp.eq.s32.totalorder %s44_s14, 0 }
  0x35   : > { %s276_s13 = sand.u32 1, %s1016_s26   ;;  %s701_s12 = sshll.u32 %s1024_s28, 7 }
  0x36   : > { %s700_s22 = sshll.u32 %s276_s13, 3  ;;  %s1188_s18 = scalar_lea.hbm %s1380_s0, %s701_s12 }
  0x37   : > { %s1182_s23 = scalar_select %p47_p11, %s1016_s26, %s49_s19  }
  0x38   : > { %s280_s8 = scalar_lea.vmem [#allocation2], %s700_s22  ;;  %p1194_p13 = pnand %p766_p12, %p1167_p6 }
  0x39   : > { %s288_s3 = sshll.u32 %s280_s8, 4  ;;  %s277_s19 = scalar_lea.sflag [#allocation3], %s276_s13  ;;  %s1190_s3 = int_to_ptr.vmem [resolvable:$true] %s288_s3 }
  0x3a   : > { %s852_s15 = scalar_lea.hbm %s1188_s18, 128  ;;  %p854_p3 = pneg %p1194_p13 }
  0x3b   : > { %p853_p0 = scmp.ne.s32.totalorder %s1188_s18, %s852_s15  ;;  %s857_s12 = scalar_lea.hbm %s1380_s0, 256 }
  0x3c   : > { %p858_p9 = scmp.lt.u32.totalorder %s1188_s18, %s1380_s0  ;;  %p859_p1 = scmp.lt.u32.totalorder %s857_s12, %s852_s15 }
  0x3d   : > { %p855_p5 = pnand %p854_p3, %p853_p0  ;;  %p861_p4 = scmp.lt.u32.totalorder %s852_s15, %s1188_s18 }
  0x3e   : > { %p860_p2 = por %p859_p1, %p858_p9 }
  0x3f   : > { %p856_p7 = pneg %p855_p5 }
  0x40   : > { %p862_p6 = por %p861_p4, %p860_p2 }
  0x42   : > { %p863_p8 = pnand %p862_p6, %p856_p7 }
  0x44   : > { %866 = shalt.err (!%p863_p8)
}
  0x45   : > { %s867_s13 = scalar_lea.vmem %s1190_s3, 128  ;;  %s1033_s17 = smov [#allocation2]  }
  0x46   : > { %p868_p12 = scmp.ne.s32.totalorder %s1190_s3, %s867_s13  ;;  %s872_s22 = sshll.u32 %s1033_s17, 4  ;;  %s873_s22 = int_to_ptr.vmem [resolvable:$false] %s872_s22 }
  0x47   : > { %s874_s8 = scalar_lea.vmem %s873_s22, 256  ;;  %p875_p5 = scmp.lt.s32.totalorder %s1190_s3, %s873_s22 }
  0x48   : > { %p870_p11 = pnand %p868_p12, %p854_p3  ;;  %p876_p9 = scmp.lt.s32.totalorder %s874_s8, %s867_s13 }
  0x4a   : > { %p871_p0 = pneg %p870_p11  ;;  %p877_p1 = por %p876_p9, %p875_p5 }
  0x4c   : > { %p878_p2 = pnand %p877_p1, %p871_p0 }
  0x4e   : > { %881 = shalt.err (!%p878_p2)
}
  0x4f   : > { %754 = dma.hbm_to_vmem [thread:$0]  (!%p1194_p13), %s1188_s18, 128, %s1190_s3, %s277_s19  }
  0x50   : > { %p1404_p7 = scmp.ne.s32.totalorder %s1396_s11, 0 }
  0x51   : > { %s1226_s15 = sand.u32 (!%p1404_p7), 1, %s1012_s25   ;;  %p1405_p3 = scmp.ne.s32.totalorder (!%p1404_p7), %s1394_s9, 0 }
  0x52   : > { %297 = sbr.rel (%p1404_p7) target bundleno = 772 (0x304), region = 40  ;;  %s1229_s12 = sshll.u32 (!%p1404_p7), %s1226_s15, 3 }
  0x53   : > { %s300_s20 = scalar_lea.sflag (!%p1404_p7), [#allocation3], %s1226_s15  ;;  %s303_s16 = scalar_lea.vmem (!%p1404_p7), [#allocation2], %s1229_s12 }
  0x59   : > { %991 = dma.done.wait (%p1405_p3), %s300_s20, 128  }
  0x5a   : > { %993 = vsyncadd (%p1405_p3), %s300_s20, 4294967168  ;;  %p1406_p13 = scmp.eq.s32.totalorder %s1110_s30, 0 }
  0x5c   : > { %995 = dma.done.wait (%p1406_p13), [#allocation6], 2048   ;;  %p1407_p4 = pmov %p1406_p13 }
  0x5d   : > { %vm351_vm0 = vcmask 523264   ;;  %v348_v0 = vld [vmem:[%s303_s16] sm:$0xff]  ;;  %v381_v7 = vld [vmem:[#allocation5 + $0x8] sm:$0xff]  ;;  %v380_v10 = vld [vmem:[#allocation5] sm:$0xff]  ;;  %v1034_v20 = vmov 0.0   ;;  %v398_v41 = vlaneseq  ;;  %s1254_s13 = sshll.u32 %s1020_s27, 7 }
  0x5e   : > { %997 = vsyncadd (%p1407_p4), [#allocation6], 4294965248  ;;  %v352_v1 = vsel %vm351_vm0, %v348_v0, 0.0  ;;  %v383_v8 = vld [vmem:[#allocation5 + $0x18] sm:$0xff]  ;;  %v382_v11 = vld [vmem:[#allocation5 + $0x10] sm:$0xff]  ;;  %475 = vmatprep.mubr.f32.mxu0 %v1034_v20  ;;  %s333_s17 = scalar_lea.vmem [#allocation7], %s1229_s12  ;;  %s1261_s16 = scalar_lea.hbm %s1385_s5, %s1254_s13 }
  0x5f   : > { %353 = vadd.xlane.f32.xlu0 %v352_v1  ;;  %v719_v9 = vpack.c.bf16 %v383_v8, %v381_v7  ;;  %v721_v12 = vpack.c.bf16 %v382_v11, %v380_v10  ;;  %v385_v13 = vld [vmem:[#allocation5 + $0x28] sm:$0xff]  ;;  %v387_v14 = vld [vmem:[#allocation5 + $0x38] sm:$0xff]  ;;  %v384_v15 = vld [vmem:[#allocation5 + $0x20] sm:$0xff]  ;;  %v399_v42 = vshrl.u32 %v398_v41, 7  ;;  %s514_s22 = sshll.u32 %s333_s17, 4  ;;  %s1035_s3 = smov 64   ;;  %s1263_s22 = int_to_ptr.vmem [resolvable:$true] %s514_s22 }
  0x60   : > { %v723_v16 = vpack.c.bf16 %v387_v14, %v385_v13  ;;  %v386_v17 = vld [vmem:[#allocation5 + $0x30] sm:$0xff]  ;;  %v389_v18 = vld [vmem:[#allocation5 + $0x48] sm:$0xff]  ;;  %v391_v19 = vld [vmem:[#allocation5 + $0x58] sm:$0xff]  ;;  %s490_s27 = scalar_lea.sflag [#allocation4], %s1226_s15  ;;  %s882_s9 = scalar_lea.vmem %s1263_s22, 128 }
  0x61   : > { %720 = vmatprep.subr.bf16.mxu0 %v719_v9  ;;  %v725_v21 = vpack.c.bf16 %v386_v17, %v384_v15  ;;  %v727_v22 = vpack.c.bf16 %v391_v19, %v389_v18  ;;  %v388_v23 = vld [vmem:[#allocation5 + $0x40] sm:$0xff]  ;;  %v390_v24 = vld [vmem:[#allocation5 + $0x50] sm:$0xff]  ;;  %v393_v25 = vld [vmem:[#allocation5 + $0x68] sm:$0xff]  ;;  %v400_v43 = vsub.s32 0, %v399_v42  ;;  %v404_v45 = vsub.s32 1, %v399_v42  ;;  %p883_p6 = scmp.ne.s32.totalorder %s1263_s22, %s882_s9  ;;  %s1036_s11 = smov [#allocation7]  }
  0x62   : > { %722 = vmatpush1.bf16.msra.mxu0 %v721_v12  ;;  %v395_v26 = vld [vmem:[#allocation5 + $0x78] sm:$0xff]  ;;  %v729_v27 = vpack.c.bf16 %v390_v24, %v388_v23  ;;  %v392_v29 = vld [vmem:[#allocation5 + $0x60] sm:$0xff]  ;;  %v394_v30 = vld [vmem:[#allocation5 + $0x70] sm:$0xff]  ;;  %s886_s18 = sshll.u32 %s1036_s11, 4  ;;  %s887_s18 = int_to_ptr.vmem [resolvable:$false] %s886_s18 }
  0x63   : > { %724 = vmatprep.subr.bf16.mxu0 %v723_v16  ;;  %v731_v28 = vpack.c.bf16 %v395_v26, %v393_v25  ;;  %v733_v31 = vpack.c.bf16 %v394_v30, %v392_v29  ;;  %v708_v36 = vld [vmem:[%s1381_s1] ss:$0 sm:$0xff]  ;;  %p884_p8 = pnand %p883_p6, %p1173_p10  ;;  %s888_s14 = scalar_lea.vmem %s887_s18, 256 }
  0x64   : > { %v709_v38 = vld [vmem:[%s1382_s2] ss:$0 sm:$0xff]  ;;  %p889_p11 = scmp.lt.s32.totalorder %s1263_s22, %s887_s18  ;;  %p890_p0 = scmp.lt.s32.totalorder %s888_s14, %s882_s9 }
  0x65   : > { %v396_v44 = vld [vmem:[%s1384_s4] sm:$0x3]  ;;  %p885_p12 = pneg %p884_p8 }
  0x66   : > { %726 = vmatpush1.bf16.msra.mxu0 %v725_v21  ;;  %v401_v46 = vrot.slane %v396_v44, %v400_v43  ;;  %v405_v47 = vrot.slane %v396_v44, %v404_v45  ;;  %p891_p5 = por %p890_p0, %p889_p11 }
  0x67   : > { %728 = vmatprep.subr.bf16.mxu0 %v727_v22 }
  0x68   : > { %p892_p9 = pnand %p891_p5, %p885_p12 }
  0x6a   : > { %730 = vmatpush1.bf16.msra.mxu0 %v729_v27 }
  0x6b   : > { %732 = vmatprep.subr.bf16.mxu0 %v731_v28 }
  0x6e   : > { %734 = vmatpush1.bf16.msra.mxu0 %v733_v31 }
  0xec   : > { %v354_v2 = vpop.xlane.xlu0 %353 }
  0xed   : > { %v356_v3 = vmul.f32 0.015625, %v354_v2 }
  0xef   : > { %v357_v4 = vsub.f32 %v348_v0, %v356_v3 }
  0xf1   : > { %v358_v5 = vmul.f32 %v357_v4, %v357_v4 }
  0xf3   : > { %v359_v6 = vsel %vm351_vm0, %v358_v5, 0.0 }
  0xf4   : > { %360 = vadd.xlane.f32.xlu0 %v359_v6 }
 0x181   : > { %v361_v32 = vpop.xlane.xlu0 %360 }
 0x182   : > { %v362_v33 = vmul.f32 0.015625, %v361_v32 }
 0x184   : > { %v363_v34 = vadd.f32 1e-05, %v362_v33 }
 0x186   : > { %822 = vrsqrt.f32 %v363_v34 }
 0x190   : > { %v823_v35 = vpop.eup %822 }
 0x191   : > { %v365_v37 = vmul.f32 %v823_v35, %v357_v4 }
 0x193   : > { %v372_v39 = vmul.f32 %v708_v36, %v365_v37 }
 0x195   : > { %v379_v40 = vadd.f32 %v709_v38, %v372_v39 }
 0x197   : > { %710 = vmatmul.mubr.msk.f32.vlgmr.msra.gmra.mrb[0].mxu0 %vm351_vm0, %v379_v40 }
 0x26a   : > { %v477_v48 = vpop.f32.mrb[0].mxu0 }
 0x26b   : > { %v478_v49 = vadd.f32 %v477_v48, %v401_v46  ;;  %v479_v50 = vpop.f32.mrb[1].mxu0 }
 0x26c   : > { %v480_v51 = vadd.f32 %v479_v50, %v405_v47 }
 0x26d   : > { %484 = vrot.lane.b32.xlu1 %v478_v49, %s1035_s3  ;;  %482 = vst.msk [vmem:[%s333_s17] sm:$0xff] %vm351_vm0, %v478_v49 }
 0x26e   : > { %895 = shalt.err (!%p892_p9)
}
 0x26f   : > { %s896_s15 = scalar_lea.hbm %s1261_s16, 128  ;;  %s900_s8 = scalar_lea.hbm %s1385_s5, 256 }
 0x270   : > { %p897_p1 = scmp.ne.s32.totalorder %s1261_s16, %s896_s15  ;;  %p901_p3 = scmp.lt.u32.totalorder %s1261_s16, %s1385_s5 }
 0x271   : > { %p902_p13 = scmp.lt.u32.totalorder %s900_s8, %s896_s15  ;;  %p904_p6 = scmp.lt.u32.totalorder %s896_s15, %s1261_s16 }
 0x272   : > { %p898_p2 = pnand %p897_p1, %p1173_p10 }
 0x273   : > { %p903_p4 = por %p902_p13, %p901_p3 }
 0x274   : > { %p899_p7 = pneg %p898_p2 }
 0x275   : > { %p905_p8 = por %p904_p6, %p903_p4 }
 0x277   : > { %p906_p12 = pnand %p905_p8, %p899_p7 }
 0x279   : > { %909 = shalt.err (!%p906_p12)
}
 0x27a   : > { %741 = dma.vmem_to_hbm [thread:$0]  (%p1173_p10), %s1263_s22, 128, %s1261_s16, %s490_s27  }
 0x27b   : > { %s347_s9 = scalar_lea.vmem [#allocation10], %s1229_s12  ;;  %s494_s11 = sand.u32 1, %s1110_s30  }
 0x27c   : > { %488 = vst.msk [vmem:[%s347_s9] sm:$0xff] %vm351_vm0, %v480_v51  ;;  %s340_s18 = scalar_lea.vmem [#allocation8], %s1229_s12  ;;  %s542_s15 = sshll.u32 %s347_s9, 4  ;;  %s1306_s15 = int_to_ptr.vmem [resolvable:$true] %s542_s15 }
 0x27d   : > { %s528_s14 = sshll.u32 %s340_s18, 4  ;;  %s1296_s8 = scalar_lea.hbm %s1386_s6, %s1254_s13  ;;  %s1298_s14 = int_to_ptr.vmem [resolvable:$true] %s528_s14 }
 0x27e   : > { %s1304_s27 = scalar_lea.hbm %s1387_s7, %s1254_s13  ;;  %s1309_s30 = scalar_lea.sflag [#allocation9], %s494_s11 }
 0x27f   : > { %s910_s12 = scalar_lea.vmem %s1298_s14, 128  ;;  %s1037_s20 = smov [#allocation8]  }
 0x280   : > { %p911_p11 = scmp.ne.s32.totalorder %s1298_s14, %s910_s12  ;;  %s914_s3 = sshll.u32 %s1037_s20, 4  ;;  %s915_s3 = int_to_ptr.vmem [resolvable:$false] %s914_s3 }
 0x281   : > { %s916_s9 = scalar_lea.vmem %s915_s3, 256  ;;  %p917_p9 = scmp.lt.s32.totalorder %s1298_s14, %s915_s3 }
 0x282   : > { %p912_p0 = pnand %p911_p11, %p1173_p10  ;;  %p918_p1 = scmp.lt.s32.totalorder %s916_s9, %s910_s12 }
 0x284   : > { %p913_p5 = pneg %p912_p0  ;;  %p919_p2 = por %p918_p1, %p917_p9 }
 0x286   : > { %p920_p7 = pnand %p919_p2, %p913_p5 }
 0x2df   : > { %v485_v52 = vpop.permute.xlu1 %484 }
 0x2e0   : > { %487 = vst.msk [vmem:[%s340_s18] sm:$0xff] %vm351_vm0, %v485_v52 }
 0x2e1   : > { %923 = shalt.err (!%p920_p7)
}
 0x2e2   : > { %s924_s13 = scalar_lea.hbm %s1296_s8, 128  ;;  %s928_s19 = scalar_lea.hbm %s1386_s6, 256 }
 0x2e3   : > { %p925_p3 = scmp.ne.s32.totalorder %s1296_s8, %s924_s13  ;;  %p929_p6 = scmp.lt.u32.totalorder %s1296_s8, %s1386_s6 }
 0x2e4   : > { %p930_p8 = scmp.lt.u32.totalorder %s928_s19, %s924_s13  ;;  %p932_p11 = scmp.lt.u32.totalorder %s924_s13, %s1296_s8 }
 0x2e5   : > { %p926_p13 = pnand %p925_p3, %p1173_p10 }
 0x2e6   : > { %p931_p12 = por %p930_p8, %p929_p6 }
 0x2e7   : > { %p927_p4 = pneg %p926_p13 }
 0x2e8   : > { %p933_p0 = por %p932_p11, %p931_p12 }
 0x2ea   : > { %p934_p5 = pnand %p933_p0, %p927_p4 }
 0x2ec   : > { %937 = shalt.err (!%p934_p5)
}
 0x2ed   : > { %742 = dma.vmem_to_hbm [thread:$0]  (%p1173_p10), %s1298_s14, 128, %s1296_s8, %s1309_s30  }
 0x2ee   : > { %s938_s16 = scalar_lea.vmem %s1306_s15, 128  ;;  %s1038_s12 = smov [#allocation10]  }
 0x2ef   : > { %p939_p9 = scmp.ne.s32.totalorder %s1306_s15, %s938_s16  ;;  %s942_s20 = sshll.u32 %s1038_s12, 4  ;;  %s943_s20 = int_to_ptr.vmem [resolvable:$false] %s942_s20 }
 0x2f0   : > { %s944_s3 = scalar_lea.vmem %s943_s20, 256  ;;  %p945_p7 = scmp.lt.s32.totalorder %s1306_s15, %s943_s20 }
 0x2f1   : > { %p940_p1 = pnand %p939_p9, %p1173_p10  ;;  %p946_p3 = scmp.lt.s32.totalorder %s944_s3, %s938_s16 }
 0x2f3   : > { %p941_p2 = pneg %p940_p1  ;;  %p947_p13 = por %p946_p3, %p945_p7 }
 0x2f5   : > { %p948_p4 = pnand %p947_p13, %p941_p2 }
 0x2f7   : > { %951 = shalt.err (!%p948_p4)
}
 0x2f8   : > { %s952_s14 = scalar_lea.hbm %s1304_s27, 128  ;;  %s956_s13 = scalar_lea.hbm %s1387_s7, 256 }
 0x2f9   : > { %p953_p6 = scmp.ne.s32.totalorder %s1304_s27, %s952_s14  ;;  %p957_p11 = scmp.lt.u32.totalorder %s1304_s27, %s1387_s7 }
 0x2fa   : > { %p958_p0 = scmp.lt.u32.totalorder %s956_s13, %s952_s14  ;;  %p960_p9 = scmp.lt.u32.totalorder %s952_s14, %s1304_s27 }
 0x2fb   : > { %p954_p8 = pnand %p953_p6, %p1173_p10 }
 0x2fc   : > { %p959_p5 = por %p958_p0, %p957_p11 }
 0x2fd   : > { %p955_p12 = pneg %p954_p8 }
 0x2fe   : > { %p961_p1 = por %p960_p9, %p959_p5 }
 0x300   : > { %p962_p2 = pnand %p961_p1, %p955_p12 }
 0x302   : > { %965 = shalt.err (!%p962_p2)
}
 0x303   : > { %743 = dma.vmem_to_hbm [thread:$0]  (%p1173_p10), %s1306_s15, 128, %s1304_s27, %s1309_s30  }
 0x304 PF: > { %s554_s19 = sand.u32 1, %s1008_s24   ;;  %p1408_p7 = scmp.ne.s32.totalorder %s1395_s10, 0 }
 0x305   : > { %p1409_p3 = scmp.ge.s32.totalorder %s1028_s29, 2  ;;  %s555_s17 = scalar_lea.sflag [#allocation4], %s554_s19 }
 0x307   : > { %p756_p13 = pnand %p1409_p3, %p1408_p7 }
 0x309   : > { %999 = dma.done.wait (!%p756_p13), %s555_s17, 128  }
 0x30a   : > { %1001 = vsyncadd (!%p756_p13), %s555_s17, 4294967168  ;;  %s1410_s22 = sadd.s32 4294967294, %s1028_s29  }
 0x30b   : > { %s563_s16 = sand.u32 1, %s1410_s22  }
 0x30c   : > { %s564_s12 = scalar_lea.sflag [#allocation9], %s563_s16 }
 0x30d   : > { %1003 = dma.done.wait (!%p756_p13), %s564_s12, 256  }
 0x30e   : > { %1005 = vsyncadd (!%p756_p13), %s564_s12, 4294967040  ;;  %s28_s29 = sadd.s32 1, %s1028_s29   ;;  %s1411_s21 = sld [smem:[#allocation15_spill]] }
 0x30f   : > { %p25_p10 = scmp.ge.s32.totalorder %s28_s29, 4   ;;  %s1412_s24 = smov %s1012_s25 }
 0x310   : > { %s1413_s25 = smov %s1016_s26  ;;  %s1414_s26 = smov %s1182_s23 }
 0x311   : > { %s1415_s27 = smov %s1024_s28  ;;  %27 = sbr.rel (!%p25_p10) target bundleno = 11 (0xb), region = 121 }
 0x314   : > { %s1416_s28 = smov %s1411_s21 }
 0x318   :  { %578 = vsyncpa [#allocation3], 1 }
 0x319   :  { %580 = vsyncpa [#allocation3 + $0x1], 1 }
 0x31a   :  { %581 = vsyncpa [#allocation6], 1 }
 0x31b   :  { %582 = vsyncpa [#allocation4], 1 }
 0x31c   :  { %584 = vsyncpa [#allocation4 + $0x1], 1 }
 0x31d   :  { %585 = vsyncpa [#allocation9], 1 }
 0x31e   :  { %587 = vsyncpa [#allocation9 + $0x1], 1 }

</bundles_post_ra>
